<compile_context>
chip_gen: v7x
topology: tpu7x:2x2x1
jax: 0.10.0
libtpu: 0.0.40
codegen_flags: <defaults>
</compile_context>

<pallas_src>
import functools
import math

import jax
import jax.numpy as jnp
from jax.experimental import pallas as pl
from jax.experimental.pallas import tpu as pltpu


# ---------------------------------------------------------------------------
# Kernels
# ---------------------------------------------------------------------------

def _se_kernel_simple(x_ref, w1_ref, w2_ref, o_ref):
    """Lane-dense path (HW % 128 == 0). Block: (Bt, C, HW), HW on lanes."""
    # Squeeze: global average pool with f32 accumulation (no full f32 copy of x).
    pooled = jnp.mean(x_ref[...], axis=-1, dtype=jnp.float32)          # (Bt, C)

    # Excitation: bias-free linear -> ReLU -> linear -> sigmoid, f32 math.
    w1 = w1_ref[...].astype(jnp.float32)
    w2 = w2_ref[...].astype(jnp.float32)
    h = jnp.maximum(jnp.dot(pooled, w1, preferred_element_type=jnp.float32), 0.0)
    s = jax.nn.sigmoid(jnp.dot(h, w2, preferred_element_type=jnp.float32))  # (Bt, C)

    # Scale: broadcast per-channel gate across lanes; multiply in the I/O dtype.
    o_ref[...] = x_ref[...] * s[:, :, None].astype(o_ref.dtype)


def _se_kernel_packed(x_ref, w1_ref, w2_ref, o_ref, *, hw, g, cg):
    """Lane-packed path for HW % 128 != 0.

    Block: (Bt*Cg, L) with L = g*hw (a multiple of 128); each row holds g
    consecutive channels of one image.  Pooling and gate broadcast are MXU
    matmuls against 0/1 block matrices, so the big block never needs a
    cross-lane relayout and all loads/stores stay full lane width.
    """
    L = g * hw
    x = x_ref[...]                                                      # (Bt*Cg, L)
    bt = x.shape[0] // cg

    # pool_mat[l, j] = 1 iff lane l belongs to channel-slot j (built w/o int div).
    lane = jax.lax.broadcasted_iota(jnp.int32, (L, g), 0)
    start = jax.lax.broadcasted_iota(jnp.int32, (L, g), 1) * hw
    pool_mat = ((lane >= start) & (lane < start + hw)).astype(x.dtype)  # (L, g)

    sums = jnp.dot(x, pool_mat, preferred_element_type=jnp.float32)     # (Bt*Cg, g)
    pooled = sums.reshape(bt, cg * g) * (1.0 / hw)                      # (Bt, C)

    w1 = w1_ref[...].astype(jnp.float32)
    w2 = w2_ref[...].astype(jnp.float32)
    h = jnp.maximum(jnp.dot(pooled, w1, preferred_element_type=jnp.float32), 0.0)
    s = jax.nn.sigmoid(jnp.dot(h, w2, preferred_element_type=jnp.float32))  # (Bt, C)

    # expand[j, l] = 1 iff lane l belongs to channel-slot j: broadcasts each
    # per-channel gate across its hw lanes with one MXU matmul (kept in the
    # I/O dtype to avoid a block-sized f32 temporary).
    lane2 = jax.lax.broadcasted_iota(jnp.int32, (g, L), 1)
    start2 = jax.lax.broadcasted_iota(jnp.int32, (g, L), 0) * hw
    expand = ((lane2 >= start2) & (lane2 < start2 + hw)).astype(o_ref.dtype)  # (g, L)

    s_rows = s.reshape(bt * cg, g).astype(o_ref.dtype)                  # (Bt*Cg, g)
    gate = jnp.dot(s_rows, expand, preferred_element_type=o_ref.dtype)  # (Bt*Cg, L)

    o_ref[...] = x * gate


# ---------------------------------------------------------------------------
# Tiling / VMEM planning
# ---------------------------------------------------------------------------

def _device_plan():
    """Generation-aware VMEM plan. Heuristic: <=64 MiB per-core VMEM => v7x-class
    dual-TC chip (small blocks, leave step parallelism); else 128 MiB single-TC."""
    cap = 64 * 1024 * 1024  # conservative default if the query fails
    try:
        cap = int(pltpu.get_tpu_info().vmem_capacity_bytes)
    except Exception:
        pass
    dual_tc = cap <= 64 * 1024 * 1024
    block_budget = (6 if dual_tc else 16) * 1024 * 1024
    vmem_ceiling = int(cap * 0.85)
    return block_budget, vmem_ceiling, dual_tc


def _lane_pack_factor(C, HW):
    """Smallest g with (g*HW) % 128 == 0 and C % g == 0; 1 if impossible/unneeded."""
    if HW % 128 == 0:
        return 1
    g = 128 // math.gcd(HW, 128)
    return g if (C % g == 0) else 1


def _choose_batch_tile(B, slab_bytes, block_budget, dual_tc, sublane_unit=None):
    """Largest batch tile dividing B that fits the block budget.

    * sublane_unit (packed path): block sublane extent is bt*sublane_unit and
      must be a multiple of 8 or cover the whole batch.
    * dual-TC chips: prefer an even grid-step count >= 4 so both TensorCores
      get work and still overlap in/out DMA per core.
    * single-TC chips: no step cap — bigger blocks amortize per-step overhead.
    """
    def legal(d):
        return sublane_unit is None or (d * sublane_unit) % 8 == 0 or d == B

    divs = [d for d in range(1, B + 1) if B % d == 0 and legal(d)]  # B always legal
    cap = max(1, block_budget // max(1, slab_bytes))
    fitting = [d for d in divs if d <= cap]
    if not fitting:
        return min(divs)  # smallest legal tile; may exceed budget (handled via vmem_limit)
    if dual_tc and B >= 2:
        want = 4 if B >= 4 else 2
        good = [d for d in fitting if (B // d) >= want and (B // d) % 2 == 0]
        if not good:
            good = [d for d in fitting if (B // d) >= 2]
        if good:
            return max(good)
    return max(fitting)


# ---------------------------------------------------------------------------
# Public entry point
# ---------------------------------------------------------------------------

@jax.jit
def se_layer(x_nchw, w1, w2):
    """SELayer forward. x_nchw: (B, C, H, W); w1: (C, C//r); w2: (C//r, C).
    Weights in (in, out) layout (= PyTorch nn.Linear.weight transposed)."""
    B, C, H, W = x_nchw.shape
    HW = H * W
    itemsize = x_nchw.dtype.itemsize

    block_budget, vmem_ceiling, dual_tc = _device_plan()
    slab = C * HW * itemsize                       # one image's activations
    g = _lane_pack_factor(C, HW)

    if g == 1:
        bt = _choose_batch_tile(B, slab, block_budget, dual_tc)
        x = x_nchw.reshape(B, C, HW)               # free reshape, HW on lanes
        kernel = _se_kernel_simple
        x_spec = pl.BlockSpec((bt, C, HW), lambda b: (b, 0, 0))
        out_spec = pl.BlockSpec((bt, C, HW), lambda b: (b, 0, 0))
        out_shape = jax.ShapeDtypeStruct((B, C, HW), x_nchw.dtype)
        extra_bytes = 0
    else:
        Cg, L = C // g, g * HW
        bt = _choose_batch_tile(B, slab, block_budget, dual_tc, sublane_unit=Cg)
        x = x_nchw.reshape(B * Cg, L)              # free reshape, lane-dense rows
        kernel = functools.partial(_se_kernel_packed, hw=HW, g=g, cg=Cg)
        x_spec = pl.BlockSpec((bt * Cg, L), lambda b: (b, 0))
        out_spec = pl.BlockSpec((bt * Cg, L), lambda b: (b, 0))
        out_shape = jax.ShapeDtypeStruct((B * Cg, L), x_nchw.dtype)
        # 0/1 pool/expand matrices + the block-sized gate temporary.
        extra_bytes = 2 * L * g * itemsize + bt * Cg * L * itemsize

    block_bytes = bt * C * HW * itemsize
    # 2x double-buffered in + 2x out + ~1 block of in-kernel temps + extras.
    need = 5 * block_bytes + extra_bytes + (4 << 20)
    vmem_limit = min(vmem_ceiling, max(need, 32 << 20))

    out = pl.pallas_call(
        kernel,
        out_shape=out_shape,
        grid_spec=pltpu.PrefetchScalarGridSpec(
            num_scalar_prefetch=0,
            grid=(B // bt,),
            in_specs=[
                x_spec,
                pl.BlockSpec(w1.shape, lambda b: (0, 0)),
                pl.BlockSpec(w2.shape, lambda b: (0, 0)),
            ],
            out_specs=out_spec,
        ),
        compiler_params=pltpu.CompilerParams(
            dimension_semantics=("parallel",),
            vmem_limit_bytes=int(vmem_limit)),
    )(x, w1, w2)

    return out.reshape(B, C, H, W)


def se_layer_ref(x_nchw, w1, w2):
    """Pure-JAX reference mirroring the PyTorch forward."""
    y = jnp.mean(x_nchw.astype(jnp.float32), axis=(2, 3))          # (B, C)
    y = jnp.maximum(y @ w1.astype(jnp.float32), 0.0)               # (B, Cr)
    y = jax.nn.sigmoid(y @ w2.astype(jnp.float32))                 # (B, C)
    return (x_nchw.astype(jnp.float32) * y[:, :, None, None]).astype(x_nchw.dtype)


if __name__ == "__main__":
    # Module config: channel=32, reduction=16 -> hidden = 2.
    B, C, reduction = 2, 32, 16
    Cr = C // reduction

    key = jax.random.PRNGKey(0)
    kx, k1, k2, kx2 = jax.random.split(key, 4)

    # Deterministic synthetic weights in (in, out) layout (i.e. PyTorch W.T).
    w1 = jax.random.normal(k1, (C, Cr), dtype=jnp.float32) * (1.0 / jnp.sqrt(C))
    w2 = jax.random.normal(k2, (Cr, C), dtype=jnp.float32) * (1.0 / jnp.sqrt(Cr))

    # 1) Lane-dense path: H*W = 256 (multiple of 128).
    H = W = 16
    x = jax.random.normal(kx, (B, C, H, W), dtype=jnp.float32)
    out = se_layer(x, w1, w2)
    jax.block_until_ready(out)
    ref = se_layer_ref(x, w1, w2)
    assert out.shape == (B, C, H, W)
    assert jnp.allclose(out, ref, atol=2e-5, rtol=2e-5), "mismatch (lane-dense path)"

    # 2) Lane-packed path: H*W = 196 (not a multiple of 128) -> g = 32.
    H2 = W2 = 14
    x2 = jax.random.normal(kx2, (B, C, H2, W2), dtype=jnp.float32)
    out2 = se_layer(x2, w1, w2)
    jax.block_until_ready(out2)
    ref2 = se_layer_ref(x2, w1, w2)
    assert out2.shape == (B, C, H2, W2)
    assert jnp.allclose(out2, ref2, atol=2e-5, rtol=2e-5), "mismatch (lane-packed path)"

    print("KERNEL_OK")
</pallas_src>

<mosaic_0001>
module attributes {stable_mosaic.version = 11 : i64} {
  func.func @_se_kernel_simple(%arg0: i32, %arg1: memref<1x32x256xf32, #tpu.memory_space<vmem>>, %arg2: memref<32x2xf32, #tpu.memory_space<vmem>>, %arg3: memref<2x32xf32, #tpu.memory_space<vmem>>, %arg4: memref<1x32x256xf32, #tpu.memory_space<vmem>>) attributes {dimension_semantics = [#tpu.dimension_semantics<parallel>], iteration_bounds = array<i64: 2>, scalar_prefetch = 0 : i64, scratch_operands = 0 : i64, tpu.core_type = #tpu.core_type<tc>, window_params = [{transform_indices = @transform_0, window_bounds = array<i64: 1, 32, 256>}, {pipeline_mode = #tpu.pipeline_mode<synchronous>, transform_indices = @transform_1, window_bounds = array<i64: 32, 2>}, {pipeline_mode = #tpu.pipeline_mode<synchronous>, transform_indices = @transform_2, window_bounds = array<i64: 2, 32>}, {transform_indices = @transform_3, window_bounds = array<i64: 1, 32, 256>}]} {
    %c0 = arith.constant 0 : index
    %c0_0 = arith.constant 0 : index
    %c0_1 = arith.constant 0 : index
    %0 = vector.load %arg1[%c0, %c0_0, %c0_1] : memref<1x32x256xf32, #tpu.memory_space<vmem>>, vector<1x32x256xf32>
    %cst = arith.constant dense<0.000000e+00> : vector<1x32xf32>
    %1 = vector.multi_reduction <add>, %0, %cst [2] : vector<1x32x256xf32> to vector<1x32xf32>
    %cst_2 = arith.constant 2.560000e+02 : f32
    %2 = vector.broadcast %cst_2 : f32 to vector<1x32xf32>
    %3 = arith.divf %1, %2 : vector<1x32xf32>
    %c0_3 = arith.constant 0 : index
    %c0_4 = arith.constant 0 : index
    %4 = vector.load %arg2[%c0_3, %c0_4] : memref<32x2xf32, #tpu.memory_space<vmem>>, vector<32x2xf32>
    %c0_5 = arith.constant 0 : index
    %c0_6 = arith.constant 0 : index
    %5 = vector.load %arg3[%c0_5, %c0_6] : memref<2x32xf32, #tpu.memory_space<vmem>>, vector<2x32xf32>
    %cst_7 = arith.constant dense<0.000000e+00> : vector<1x2xf32>
    %6 = tpu.matmul %3, %4, %cst_7 {dimension_numbers = #tpu.dot_dimension_numbers<[1], [0], [0], [1], [0, 0, 1, 1], [], []>} : vector<1x32xf32>, vector<32x2xf32>, vector<1x2xf32> -> vector<1x2xf32>
    %cst_8 = arith.constant 0.000000e+00 : f32
    %7 = vector.broadcast %cst_8 : f32 to vector<1x2xf32>
    %8 = arith.maximumf %6, %7 : vector<1x2xf32>
    %cst_9 = arith.constant dense<0.000000e+00> : vector<1x32xf32>
    %9 = tpu.matmul %8, %5, %cst_9 {dimension_numbers = #tpu.dot_dimension_numbers<[1], [0], [0], [1], [0, 0, 1, 1], [], []>} : vector<1x2xf32>, vector<2x32xf32>, vector<1x32xf32> -> vector<1x32xf32>
    %10 = arith.negf %9 : vector<1x32xf32>
    %11 = math.exp %10 : vector<1x32xf32>
    %cst_10 = arith.constant 1.000000e+00 : f32
    %12 = vector.broadcast %cst_10 : f32 to vector<1x32xf32>
    %13 = arith.addf %12, %11 : vector<1x32xf32>
    %14 = arith.divf %12, %13 : vector<1x32xf32>
    %c0_11 = arith.constant 0 : index
    %c0_12 = arith.constant 0 : index
    %c0_13 = arith.constant 0 : index
    %15 = vector.load %arg1[%c0_11, %c0_12, %c0_13] : memref<1x32x256xf32, #tpu.memory_space<vmem>>, vector<1x32x256xf32>
    %16 = vector.shape_cast %14 : vector<1x32xf32> to vector<1x32x1xf32>
    %17 = vector.broadcast %16 : vector<1x32x1xf32> to vector<1x32x256xf32>
    %18 = arith.mulf %15, %17 : vector<1x32x256xf32>
    %c0_14 = arith.constant 0 : index
    %c0_15 = arith.constant 0 : index
    %c0_16 = arith.constant 0 : index
    %19 = vector.load %arg4[%c0_14, %c0_15, %c0_16] : memref<1x32x256xf32, #tpu.memory_space<vmem>>, vector<1x32x256xf32>
    tpu.vector_store %arg4[%c0_14, %c0_15, %c0_16], %18 {strides = array<i32>} : memref<1x32x256xf32, #tpu.memory_space<vmem>>, vector<1x32x256xf32>,
    return
  }
  func.func @transform_0(%arg0: i32) -> (i32, i32, i32) {
    %c0_i32 = arith.constant 0 : i32
    %c0_i32_0 = arith.constant 0 : i32
    %c0_i32_1 = arith.constant 0 : i32
    return %arg0, %c0_i32, %c0_i32_0 : i32, i32, i32
  }
  func.func @transform_1(%arg0: i32) -> (i32, i32) {
    %c0_i32 = arith.constant 0 : i32
    %c0_i32_0 = arith.constant 0 : i32
    %c0_i32_1 = arith.constant 0 : i32
    return %c0_i32, %c0_i32_0 : i32, i32
  }
  func.func @transform_2(%arg0: i32) -> (i32, i32) {
    %c0_i32 = arith.constant 0 : i32
    %c0_i32_0 = arith.constant 0 : i32
    %c0_i32_1 = arith.constant 0 : i32
    return %c0_i32, %c0_i32_0 : i32, i32
  }
  func.func @transform_3(%arg0: i32) -> (i32, i32, i32) {
    %c0_i32 = arith.constant 0 : i32
    %c0_i32_0 = arith.constant 0 : i32
    %c0_i32_1 = arith.constant 0 : i32
    return %arg0, %c0_i32, %c0_i32_0 : i32, i32, i32
  }
}

</mosaic_0001>

<bundles_post_ra>
// kernel: se_layer.1
= control target key start
LH: loop header
LB: loop body
LE: loop exit
PB: predicated region body
PF: predicated region fallthrough
CT: control target
= control target key end

     0   :  { %s572_s12 = smov 0   ;;  %s643_s0 = inlined_call_operand.vmem [shape: f32[2,32,256], index: 0, kind: input, shape index: {}]   ;;  %s644_s1 = inlined_call_operand.vmem [shape: f32[32,2], index: 1, kind: input, shape index: {}]   ;;  %s645_s2 = inlined_call_operand.vmem [shape: f32[2,32], index: 2, kind: input, shape index: {}]   ;;  %s646_s3 = inlined_call_operand.vmem [shape: f32[2,32,256], index: 3, kind: output, shape index: {}]  }
   0x1 LB: > { %s480_s13 = sadd.s32 4294967295, %s547_s12   ;;  %p484_p0 = scmp.ge.s32.totalorder %s547_s12, 1  ;;  %s547_s12 = sphi %s572_s12, %s13_s12  }
   0x2   : > { %p137_p1 = scmp.lt.s32.totalorder %s547_s12, 3 }
   0x4   : > { %p138_p2 = pnand %p484_p0, %p137_p1 }
   0x5   : > { %p161_p3 = scmp.lt.s32.totalorder (!%p138_p2), %s480_s13, 1  ;;  %v196_v12 = vld [vmem:[%s644_s1] sm:$0xff] (!%p138_p2)  ;;  %v197_v13 = vld [vmem:[%s644_s1 + $0x8] sm:$0xff] (!%p138_p2)  ;;  %v549_v15 = vmov (!%p138_p2), 0.0|0.0   ;;  %v198_v16 = vld [vmem:[%s644_s1 + $0x10] sm:$0xff] (!%p138_p2)  ;;  %vm550_vm0 = vmmov (!%p138_p2), 0   ;;  %v205_v20 = vlaneseq (!%p138_p2) }
   0x6   : > { %141 = sbr.rel (%p138_p2) target bundleno = 752 (0x2f0), region = 32  ;;  %v521_v14 = vpack.c.bf16 (!%p138_p2), %v197_v13, %v196_v12  ;;  %520 = vmatprep.subr.bf16.mxu0 (!%p138_p2), %v549_v15  ;;  %v199_v17 = vld [vmem:[%s644_s1 + $0x18] sm:$0xff] (!%p138_p2)  ;;  %v551_v19 = vmov (!%p138_p2), 0.0   ;;  %vm216_vm1 = vcmask (!%p138_p2), 130112   ;;  %vm223_vm2 = vcmask (!%p138_p2), 195712  }
   0x7   : > { %v524_v18 = vpack.c.bf16 (!%p138_p2), %v199_v17, %v198_v16  ;;  %512 = vmatprep.mubr.msk.f32.mxu0 (!%p138_p2), %vm550_vm0, %v551_v19  ;;  %515 = vmatprep.subr.mxu1 (!%p138_p2), %v551_v19  ;;  %v206_v21 = vand.u32 (!%p138_p2), 127, %v205_v20  ;;  %v208_v22 = vshrl.u32 (!%p138_p2), %v205_v20, 7  ;;  %vm230_vm3 = vcmask (!%p138_p2), 261312   ;;  %v200_v45 = vld [vmem:[%s645_s2] sm:$0x3] (!%p138_p2) }
   0x8   : > { %522 = vmatpush3.bf16.msra.mxu0 (!%p138_p2), %v521_v14  ;;  %517 = vmatprep.mubr.msk.f32.mxu1 (!%p138_p2), %vm550_vm0, %v551_v19  ;;  %vm232_vm4 = vcmask (!%p138_p2), 261120   ;;  %vm310_vm5 = vcmask (!%p138_p2), 1041408   ;;  %vm306_vm6 = vcmask (!%p138_p2), 15360  }
   0x9   : > { %523 = vmatprep.subr.bf16.mxu0 (!%p138_p2), %v549_v15  ;;  %v211_v23 = vadd.s32 (!%p138_p2), 4294967288, %v206_v21  ;;  %v218_v25 = vadd.s32 (!%p138_p2), 4294967280, %v206_v21  ;;  %v225_v26 = vadd.s32 (!%p138_p2), 4294967272, %v206_v21  ;;  %v209_v28 = vsub.s32 (!%p138_p2), %v206_v21, %v208_v22  ;;  %516 = vmatpush3.msk.msra.mxu1 (!%p138_p2), %vm310_vm5, %v200_v45 }
   0xa   : > { %v392_v54 = vsub.s32 (!%p138_p2), 0, %v208_v22 }
   0xb   : > { %v214_v30 = vsub.s32 (!%p138_p2), %v211_v23, %v208_v22  ;;  %v221_v31 = vsub.s32 (!%p138_p2), %v218_v25, %v208_v22  ;;  %v228_v34 = vsub.s32 (!%p138_p2), %v225_v26, %v208_v22 }
   0xc   : > { %525 = vmatpush3.bf16.msra.mxu0 (!%p138_p2), %v524_v18 }
   0xd   : > { %s648_s13 = smov (!%p161_p3, %s480_s13), 1 }
   0xe   : > { %s495_s14 = sshll.u32 %s648_s13, 6 }
   0xf   : > { %s165_s17 = scalar_lea.vmem %s643_s0, %s495_s14  ;;  %s170_s30 = scalar_lea.vmem %s646_s3, %s495_s14 }
  0x10   : > { %v588_v0 = vld [vmem:[%s165_s17] sm:$0xff]  ;;  %v590_v1 = vld [vmem:[%s165_s17 + $0x8] sm:$0xff]  ;;  %v598_v5 = vld [vmem:[%s165_s17 + $0x10] sm:$0xff] }
  0x11   : > { %v592_v2 = vld [vmem:[%s165_s17 + $0x20] sm:$0xff]  ;;  %v179_v3 = vadd.f32 %v590_v1, %v588_v0  ;;  %v596_v4 = vld [vmem:[%s165_s17 + $0x28] sm:$0xff]  ;;  %v600_v6 = vld [vmem:[%s165_s17 + $0x18] sm:$0xff] }
  0x12   : > { %v185_v7 = vadd.f32 %v596_v4, %v592_v2  ;;  %v604_v8 = vld [vmem:[%s165_s17 + $0x30] sm:$0xff]  ;;  %v606_v9 = vld [vmem:[%s165_s17 + $0x38] sm:$0xff]  ;;  %v182_v10 = vadd.f32 %v600_v6, %v598_v5 }
  0x13   : > { %180 = vadd.xlane.f32.xlu0 %v179_v3  ;;  %v188_v11 = vadd.f32 %v606_v9, %v604_v8 }
  0x14   : > { %186 = vadd.xlane.f32.xlu1 %v185_v7 }
  0x17   : > { %183 = vadd.xlane.f32.xlu0 %v182_v10 }
  0x18   : > { %189 = vadd.xlane.f32.xlu1 %v188_v11 }
  0xa0   : > { %v181_v24 = vpop.xlane.xlu0 %180 }
  0xa1   : > { %v187_v27 = vpop.xlane.xlu1 %186  ;;  %v192_v29 = vmul.f32 0.00390625, %v181_v24 }
  0xa2   : > { %v194_v32 = vmul.f32 0.00390625, %v187_v27 }
  0xa3   : > { %v210_v38 = vrot.slane %v192_v29, %v209_v28 }
  0xa4   : > { %v184_v33 = vpop.xlane.xlu0 %183  ;;  %v222_v40 = vrot.slane %v194_v32, %v221_v31 }
  0xa5   : > { %v193_v35 = vmul.f32 0.00390625, %v184_v33  ;;  %v190_v36 = vpop.xlane.xlu1 %189 }
  0xa6   : > { %v195_v37 = vmul.f32 0.00390625, %v190_v36 }
  0xa7   : > { %v215_v39 = vrot.slane %v193_v35, %v214_v30 }
  0xa8   : > { %v229_v41 = vrot.slane %v195_v37, %v228_v34 }
  0xa9   : > { %v217_v42 = vsel %vm216_vm1, %v215_v39, %v210_v38 }
  0xaa   : > { %v224_v43 = vsel %vm223_vm2, %v222_v40, %v217_v42 }
  0xab   : > { %v231_v44 = vsel %vm230_vm3, %v229_v41, %v224_v43 }
  0xac   : > { %513 = vmatmul.mubr.msk.f32.vlgmr.msra.gmra.mrb[0].mxu0 %vm232_vm4, %v231_v44 }
 0x17f   : > { %v301_v46 = vpop.f32.mrb[0].mxu0 }
 0x180   : > { %v305_v47 = vmax.f32 %v301_v46, 0.0  ;;  %v514_v48 = vpop.f32.mrb[1].mxu0 }
 0x182   : > { %518 = vmatmul.mubr.msk.f32.vlgmr.msra.gmra.mrb[0].mxu1 %vm306_vm6, %v305_v47 }
 0x255   : > { %v380_v49 = vpop.f32.mrb[0].mxu1 }
 0x256   : > { %v492_v50 = vmul.f32 -1.442695, %v380_v49  ;;  %v519_v51 = vpop.f32.mrb[1].mxu1 }
 0x258   : > { %537 = vpow2.f32 %v492_v50 }
 0x262   : > { %v538_v52 = vpop.eup %537 }
 0x263   : > { %v387_v53 = vadd.f32 1.0, %v538_v52 }
 0x265   : > { %539 = vrcp.f32 %v387_v53 }
 0x26f   : > { %v540_v55 = vpop.eup %539 }
 0x270   : > { %v393_v56 = vrot.slane %v540_v55, %v392_v54 }
 0x272   : > { %399 = vbcast.lane.b32.xlu1 %v393_v56, 264  ;;  %395 = vbcast.lane.b32.xlu0 %v393_v56, 256 }
 0x276   : > { %403 = vbcast.lane.b32.xlu1 %v393_v56, 272 }
 0x27a   : > { %407 = vbcast.lane.b32.xlu1 %v393_v56, 280 }
 0x2e4   : > { %v400_v57 = vpop.permute.xlu1 %399  ;;  %v396_v58 = vpop.permute.xlu0 %395 }
 0x2e5   : > { %v411_v59 = vmul.f32 %v400_v57, %v598_v5  ;;  %v412_v60 = vmul.f32 %v400_v57, %v600_v6  ;;  %v409_v61 = vmul.f32 %v396_v58, %v588_v0  ;;  %v410_v62 = vmul.f32 %v396_v58, %v590_v1 }
 0x2e7   : > { %419 = vst [vmem:[%s170_s30 + $0x10] sm:$0xff] %v411_v59  ;;  %420 = vst [vmem:[%s170_s30 + $0x18] sm:$0xff] %v412_v60 }
 0x2e8   : > { %417 = vst [vmem:[%s170_s30] sm:$0xff] %v409_v61  ;;  %418 = vst [vmem:[%s170_s30 + $0x8] sm:$0xff] %v410_v62  ;;  %v404_v63 = vpop.permute.xlu1 %403 }
 0x2e9   : > { %v413_v3 = vmul.f32 %v404_v63, %v592_v2  ;;  %v414_v7 = vmul.f32 %v404_v63, %v596_v4 }
 0x2eb   : > { %421 = vst [vmem:[%s170_s30 + $0x20] sm:$0xff] %v413_v3  ;;  %422 = vst [vmem:[%s170_s30 + $0x28] sm:$0xff] %v414_v7 }
 0x2ec   : > { %v408_v10 = vpop.permute.xlu1 %407 }
 0x2ed   : > { %v415_v5 = vmul.f32 %v408_v10, %v604_v8  ;;  %v416_v6 = vmul.f32 %v408_v10, %v606_v9 }
 0x2ef   : > { %423 = vst [vmem:[%s170_s30 + $0x30] sm:$0xff] %v415_v5  ;;  %424 = vst [vmem:[%s170_s30 + $0x38] sm:$0xff] %v416_v6 }
 0x2f0 PF: > { %s13_s12 = sadd.s32 1, %s547_s12  }
 0x2f1   : > { %p10_p4 = scmp.ge.s32.totalorder %s13_s12, 4  }
 0x2f3   :  { %12 = sbr.rel (!%p10_p4) target bundleno = 1 (0x1), region = 62 }

</bundles_post_ra>
